<compile_context>
chip_gen: v6e
topology: v6e:2x2x1
jax: 0.10.0
libtpu: 0.0.40
codegen_flags: <defaults>
</compile_context>

<pallas_src>
import math

import jax
import jax.numpy as jnp
from jax.experimental import pallas as pl
from jax.experimental.pallas import tpu as pltpu


def _upsample_kernel(x_ref, e_ref, w_ref, b_ref, o_ref):
    """Fused 1x1-conv + PixelShuffle for one (batch, row-tile) grid step.

    x_ref: (1, Cin, th, W)      input rows (original NCHW layout)
    e_ref: (W, W*r)             0/1 lane-repeat matrix, E[w, j] = (j // r == w)
    w_ref: (C*r*Cin, W*r) f32   lane-periodic weights:
                                w[(c*r+rh)*Cin+i, j] = W[c*r^2+rh*r+(j%r), i]
    b_ref: (C*r, W*r)     f32   lane-periodic bias:
                                b[c*r+rh, j] = bias[c*r^2+rh*r+(j%r)]
    o_ref: (1, C, th, r*W*r)    output rows; lane = rh*(W*r) + w*r + rw
    """
    cin, th = x_ref.shape[1], x_ref.shape[2]
    wr = e_ref.shape[1]
    c_out = o_ref.shape[1]
    r = o_ref.shape[3] // wr

    e = e_ref[...]
    # Lane-repeat each input channel once (shared by all Cout outputs):
    # xrep[i][t, w*r + rw] = x[i, t, w];  f32 accumulate on the (idle) MXU.
    xrep = [
        jnp.dot(x_ref[0, i], e, preferred_element_type=jnp.float32)
        for i in range(cin)
    ]

    wl = w_ref[...]   # (C*r*Cin, W*r) float32
    bl = b_ref[...]   # (C*r,     W*r) float32

    for c in range(c_out):
        for rh in range(r):
            g = c * r + rh
            acc = bl[g][None, :]                               # (1, W*r) f32
            for i in range(cin):
                acc = acc + wl[g * cin + i][None, :] * xrep[i]  # (th, W*r) f32
            # Store the already-shuffled row chunk: output lane
            # rh*(W*r) + w*r + rw  ==  PixelShuffle position (h*r+rh, w*r+rw).
            o_ref[0, c, :, rh * wr:(rh + 1) * wr] = acc.astype(o_ref.dtype)


def _choose_th(batch, h, w, cin, c_out, r, itemsize):
    """Rows per grid step: large enough that each step moves MBs of HBM traffic
    (per-step Pallas overhead ~0.35us), small enough that the double-buffered
    in+out blocks plus f32 scratch stay well inside every generation's
    scoped-VMEM default (v5e 16 MiB, v6e/v7x 32 MiB; v7x physical is 64 MiB)."""
    per_row = 2 * (cin + c_out * r * r) * w * itemsize + cin * w * r * 4
    budget = 6 * 1024 * 1024
    th = max(8, min(1024, (budget // per_row) // 8 * 8))
    if th >= h:
        th = h                        # single full-extent tile along H (always legal)
        if batch == 1 and h > 8:
            # Keep >=2 steps on a "parallel" grid axis so both v7x TensorCores work.
            half = -(-h // 2)
            half = -(-half // 8) * 8
            if half < h:
                th = half
    return th


def upsample_forward(x, weight, bias, factor):
    """UpSample.forward: 1x1 conv (n_chan -> n_chan*factor^2) + PixelShuffle(factor).

    x:      (B, Cin, H, W)    float32 or bfloat16 (bf16 halves HBM traffic;
                              weights/bias/accumulation remain float32)
    weight: (Cout, Cin, 1, 1) with Cout = Cin * factor * factor
    bias:   (Cout,)
    returns (B, Cin, H*factor, W*factor), dtype of x
    """
    b_, cin, h, w = x.shape
    r = int(factor)
    cout = weight.shape[0]
    c_out = cout // (r * r)
    assert c_out * r * r == cout and c_out == cin
    wr = w * r

    # --- tiny host-side parameter rearrangement (O(Cout*W) elements) ---
    w2 = weight.reshape(cout, cin).astype(jnp.float32)
    w4 = w2.reshape(c_out, r, r, cin)                         # [c, rh, rw, i]
    wlane = jnp.tile(jnp.transpose(w4, (0, 1, 3, 2)),          # [c, rh, i, rw]
                     (1, 1, 1, w)).reshape(c_out * r * cin, wr)
    blane = jnp.tile(bias.astype(jnp.float32).reshape(c_out, r, r),
                     (1, 1, w)).reshape(c_out * r, wr)
    erep = (jnp.arange(w)[:, None] == (jnp.arange(wr)[None, :] // r)).astype(x.dtype)
    # TODO(synk): also tile the W axis for very wide inputs (erep is O(W^2) and
    # is kept fully VMEM-resident here).

    itemsize = jnp.dtype(x.dtype).itemsize
    th = _choose_th(b_, h, w, cin, c_out, r, itemsize)
    grid = (b_, pl.cdiv(h, th))

    cost = pl.CostEstimate(
        flops=2 * b_ * h * w * cin * cout + 2 * b_ * h * w * w * r * cin,
        transcendentals=0,
        bytes_accessed=(x.size + b_ * c_out * h * r * wr) * itemsize
        + (wlane.size + blane.size) * 4 + erep.size * itemsize,
    )

    out = pl.pallas_call(
        _upsample_kernel,
        out_shape=jax.ShapeDtypeStruct((b_, c_out, h, r * wr), x.dtype),
        grid_spec=pltpu.PrefetchScalarGridSpec(
            num_scalar_prefetch=0,
            grid=grid,
            in_specs=[
                pl.BlockSpec((1, cin, th, w), lambda bi, hi: (bi, 0, hi, 0)),
                pl.BlockSpec((w, wr), lambda bi, hi: (0, 0)),
                pl.BlockSpec((c_out * r * cin, wr), lambda bi, hi: (0, 0)),
                pl.BlockSpec((c_out * r, wr), lambda bi, hi: (0, 0)),
            ],
            out_specs=pl.BlockSpec((1, c_out, th, r * wr),
                                   lambda bi, hi: (bi, 0, hi, 0)),
        ),
        compiler_params=pltpu.CompilerParams(
            dimension_semantics=("parallel", "parallel"),
        ),
        cost_estimate=cost,
    )(x, erep, wlane, blane)

    # (B, C, H, r*W*r) -> (B, C, H*r, W*r) is a pure row-major reshape (free):
    # lane index rh*(W*r) + w*r + rw is exactly PixelShuffle's memory order.
    return out.reshape(b_, c_out, h * r, w * r)


def _pixel_shuffle_ref(x_nchw, r):
    """Reference PixelShuffle (PyTorch semantics), plain JAX, used for checking."""
    b_, crr, h, w = x_nchw.shape
    c = crr // (r * r)
    x = x_nchw.reshape(b_, c, r, r, h, w)
    x = jnp.transpose(x, (0, 1, 4, 2, 5, 3))   # (B, C, H, r, W, r)
    return x.reshape(b_, c, h * r, w * r)


def init_params(key, n_chan, factor):
    """Deterministic parameter init mirroring the module's __init__."""
    out_chan = n_chan * factor * factor
    k_w, k_b = jax.random.split(key)
    # xavier_normal_(gain=1.0): std = sqrt(2 / (fan_in + fan_out)), fan = C*kh*kw
    fan_in = n_chan * 1 * 1
    fan_out = out_chan * 1 * 1
    std = math.sqrt(2.0 / (fan_in + fan_out))
    weight = std * jax.random.normal(k_w, (out_chan, n_chan, 1, 1), jnp.float32)
    # Conv2d default bias init: U(-1/sqrt(fan_in), 1/sqrt(fan_in))
    bound = 1.0 / math.sqrt(fan_in)
    bias = jax.random.uniform(
        k_b, (out_chan,), jnp.float32, minval=-bound, maxval=bound
    )
    return weight, bias


if __name__ == "__main__":
    key = jax.random.PRNGKey(0)
    k_x, k_p = jax.random.split(key)

    B, C, H, W = 2, 4, 16, 16
    factor = 2

    x = jax.random.normal(k_x, (B, C, H, W), jnp.float32)
    weight, bias = init_params(k_p, C, factor)

    out = upsample_forward(x, weight, bias, factor)
    out = jax.block_until_ready(out)

    # Plain-JAX reference: conv as einsum + PixelShuffle as reshape/transpose.
    y_ref = (
        jnp.einsum("bchw,oc->bohw", x, weight.reshape(-1, C))
        + bias[None, :, None, None]
    )
    ref = _pixel_shuffle_ref(y_ref, factor)

    assert out.shape == (B, C, H * factor, W * factor), out.shape
    assert jnp.allclose(out, ref, atol=1e-5, rtol=1e-5)

    # bf16 I/O path (halves HBM traffic on v6e/v7x; accumulation stays f32).
    out_bf16 = upsample_forward(x.astype(jnp.bfloat16), weight, bias, factor)
    out_bf16 = jax.block_until_ready(out_bf16)
    assert out_bf16.dtype == jnp.bfloat16
    assert jnp.allclose(out_bf16.astype(jnp.float32), ref, atol=1e-1, rtol=1e-1)

    print("KERNEL_OK")
</pallas_src>

<mosaic_0001>
module attributes {stable_mosaic.version = 11 : i64} {
  func.func @_upsample_kernel(%arg0: i32, %arg1: i32, %arg2: memref<1x4x16x16xf32, #tpu.memory_space<vmem>>, %arg3: memref<16x32xf32, #tpu.memory_space<vmem>>, %arg4: memref<32x32xf32, #tpu.memory_space<vmem>>, %arg5: memref<8x32xf32, #tpu.memory_space<vmem>>, %arg6: memref<1x4x16x64xf32, #tpu.memory_space<vmem>>) attributes {dimension_semantics = [#tpu.dimension_semantics<parallel>, #tpu.dimension_semantics<parallel>], iteration_bounds = array<i64: 2, 1>, scalar_prefetch = 0 : i64, scratch_operands = 0 : i64, tpu.core_type = #tpu.core_type<tc>, window_params = [{transform_indices = @transform_0, window_bounds = array<i64: 1, 4, 16, 16>}, {pipeline_mode = #tpu.pipeline_mode<synchronous>, transform_indices = @transform_1, window_bounds = array<i64: 16, 32>}, {pipeline_mode = #tpu.pipeline_mode<synchronous>, transform_indices = @transform_2, window_bounds = array<i64: 32, 32>}, {pipeline_mode = #tpu.pipeline_mode<synchronous>, transform_indices = @transform_3, window_bounds = array<i64: 8, 32>}, {transform_indices = @transform_4, window_bounds = array<i64: 1, 4, 16, 64>}]} {
    %c0 = arith.constant 0 : index
    %c0_0 = arith.constant 0 : index
    %0 = vector.load %arg3[%c0, %c0_0] : memref<16x32xf32, #tpu.memory_space<vmem>>, vector<16x32xf32>
    %c0_1 = arith.constant 0 : index
    %c0_2 = arith.constant 0 : index
    %c0_3 = arith.constant 0 : index
    %c0_4 = arith.constant 0 : index
    %1 = vector.load %arg2[%c0_1, %c0_2, %c0_3, %c0_4] : memref<1x4x16x16xf32, #tpu.memory_space<vmem>>, vector<1x1x16x16xf32>
    %2 = vector.shape_cast %1 : vector<1x1x16x16xf32> to vector<16x16xf32>
    %cst = arith.constant dense<0.000000e+00> : vector<16x32xf32>
    %3 = tpu.matmul %2, %0, %cst {dimension_numbers = #tpu.dot_dimension_numbers<[1], [0], [0], [1], [0, 0, 1, 1], [], []>} : vector<16x16xf32>, vector<16x32xf32>, vector<16x32xf32> -> vector<16x32xf32>
    %c0_5 = arith.constant 0 : index
    %c1 = arith.constant 1 : index
    %c0_6 = arith.constant 0 : index
    %c0_7 = arith.constant 0 : index
    %4 = vector.load %arg2[%c0_5, %c1, %c0_6, %c0_7] : memref<1x4x16x16xf32, #tpu.memory_space<vmem>>, vector<1x1x16x16xf32>
    %5 = vector.shape_cast %4 : vector<1x1x16x16xf32> to vector<16x16xf32>
    %cst_8 = arith.constant dense<0.000000e+00> : vector<16x32xf32>
    %6 = tpu.matmul %5, %0, %cst_8 {dimension_numbers = #tpu.dot_dimension_numbers<[1], [0], [0], [1], [0, 0, 1, 1], [], []>} : vector<16x16xf32>, vector<16x32xf32>, vector<16x32xf32> -> vector<16x32xf32>
    %c0_9 = arith.constant 0 : index
    %c2 = arith.constant 2 : index
    %c0_10 = arith.constant 0 : index
    %c0_11 = arith.constant 0 : index
    %7 = vector.load %arg2[%c0_9, %c2, %c0_10, %c0_11] : memref<1x4x16x16xf32, #tpu.memory_space<vmem>>, vector<1x1x16x16xf32>
    %8 = vector.shape_cast %7 : vector<1x1x16x16xf32> to vector<16x16xf32>
    %cst_12 = arith.constant dense<0.000000e+00> : vector<16x32xf32>
    %9 = tpu.matmul %8, %0, %cst_12 {dimension_numbers = #tpu.dot_dimension_numbers<[1], [0], [0], [1], [0, 0, 1, 1], [], []>} : vector<16x16xf32>, vector<16x32xf32>, vector<16x32xf32> -> vector<16x32xf32>
    %c0_13 = arith.constant 0 : index
    %c3 = arith.constant 3 : index
    %c0_14 = arith.constant 0 : index
    %c0_15 = arith.constant 0 : index
    %10 = vector.load %arg2[%c0_13, %c3, %c0_14, %c0_15] : memref<1x4x16x16xf32, #tpu.memory_space<vmem>>, vector<1x1x16x16xf32>
    %11 = vector.shape_cast %10 : vector<1x1x16x16xf32> to vector<16x16xf32>
    %cst_16 = arith.constant dense<0.000000e+00> : vector<16x32xf32>
    %12 = tpu.matmul %11, %0, %cst_16 {dimension_numbers = #tpu.dot_dimension_numbers<[1], [0], [0], [1], [0, 0, 1, 1], [], []>} : vector<16x16xf32>, vector<16x32xf32>, vector<16x32xf32> -> vector<16x32xf32>
    %c0_17 = arith.constant 0 : index
    %c0_18 = arith.constant 0 : index
    %13 = vector.load %arg4[%c0_17, %c0_18] : memref<32x32xf32, #tpu.memory_space<vmem>>, vector<32x32xf32>
    %c0_19 = arith.constant 0 : index
    %c0_20 = arith.constant 0 : index
    %14 = vector.load %arg5[%c0_19, %c0_20] : memref<8x32xf32, #tpu.memory_space<vmem>>, vector<8x32xf32>
    %15 = vector.extract_strided_slice %14 {offsets = [0, 0], sizes = [1, 32], strides = [1, 1]} : vector<8x32xf32> to vector<1x32xf32>
    %16 = vector.shape_cast %15 : vector<1x32xf32> to vector<32xf32>
    %17 = vector.shape_cast %16 : vector<32xf32> to vector<1x32xf32>
    %18 = vector.extract_strided_slice %13 {offsets = [0, 0], sizes = [1, 32], strides = [1, 1]} : vector<32x32xf32> to vector<1x32xf32>
    %19 = vector.shape_cast %18 : vector<1x32xf32> to vector<32xf32>
    %20 = vector.shape_cast %19 : vector<32xf32> to vector<1x32xf32>
    %21 = vector.broadcast %20 : vector<1x32xf32> to vector<16x32xf32>
    %22 = arith.mulf %21, %3 : vector<16x32xf32>
    %23 = vector.broadcast %17 : vector<1x32xf32> to vector<16x32xf32>
    %24 = arith.addf %23, %22 : vector<16x32xf32>
    %25 = vector.extract_strided_slice %13 {offsets = [1, 0], sizes = [1, 32], strides = [1, 1]} : vector<32x32xf32> to vector<1x32xf32>
    %26 = vector.shape_cast %25 : vector<1x32xf32> to vector<32xf32>
    %27 = vector.shape_cast %26 : vector<32xf32> to vector<1x32xf32>
    %28 = vector.broadcast %27 : vector<1x32xf32> to vector<16x32xf32>
    %29 = arith.mulf %28, %6 : vector<16x32xf32>
    %30 = arith.addf %24, %29 : vector<16x32xf32>
    %31 = vector.extract_strided_slice %13 {offsets = [2, 0], sizes = [1, 32], strides = [1, 1]} : vector<32x32xf32> to vector<1x32xf32>
    %32 = vector.shape_cast %31 : vector<1x32xf32> to vector<32xf32>
    %33 = vector.shape_cast %32 : vector<32xf32> to vector<1x32xf32>
    %34 = vector.broadcast %33 : vector<1x32xf32> to vector<16x32xf32>
    %35 = arith.mulf %34, %9 : vector<16x32xf32>
    %36 = arith.addf %30, %35 : vector<16x32xf32>
    %37 = vector.extract_strided_slice %13 {offsets = [3, 0], sizes = [1, 32], strides = [1, 1]} : vector<32x32xf32> to vector<1x32xf32>
    %38 = vector.shape_cast %37 : vector<1x32xf32> to vector<32xf32>
    %39 = vector.shape_cast %38 : vector<32xf32> to vector<1x32xf32>
    %40 = vector.broadcast %39 : vector<1x32xf32> to vector<16x32xf32>
    %41 = arith.mulf %40, %12 : vector<16x32xf32>
    %42 = arith.addf %36, %41 : vector<16x32xf32>
    %c0_21 = arith.constant 0 : index
    %c0_22 = arith.constant 0 : index
    %c0_23 = arith.constant 0 : index
    %c0_24 = arith.constant 0 : index
    %43 = vector.load %arg6[%c0_21, %c0_22, %c0_23, %c0_24] : memref<1x4x16x64xf32, #tpu.memory_space<vmem>>, vector<1x1x16x32xf32>
    %44 = vector.shape_cast %43 : vector<1x1x16x32xf32> to vector<16x32xf32>
    %45 = vector.shape_cast %42 : vector<16x32xf32> to vector<1x1x16x32xf32>
    tpu.vector_store %arg6[%c0_21, %c0_22, %c0_23, %c0_24], %45 {strides = array<i32>} : memref<1x4x16x64xf32, #tpu.memory_space<vmem>>, vector<1x1x16x32xf32>,
    %46 = vector.extract_strided_slice %14 {offsets = [1, 0], sizes = [1, 32], strides = [1, 1]} : vector<8x32xf32> to vector<1x32xf32>
    %47 = vector.shape_cast %46 : vector<1x32xf32> to vector<32xf32>
    %48 = vector.shape_cast %47 : vector<32xf32> to vector<1x32xf32>
    %49 = vector.extract_strided_slice %13 {offsets = [4, 0], sizes = [1, 32], strides = [1, 1]} : vector<32x32xf32> to vector<1x32xf32>
    %50 = vector.shape_cast %49 : vector<1x32xf32> to vector<32xf32>
    %51 = vector.shape_cast %50 : vector<32xf32> to vector<1x32xf32>
    %52 = vector.broadcast %51 : vector<1x32xf32> to vector<16x32xf32>
    %53 = arith.mulf %52, %3 : vector<16x32xf32>
    %54 = vector.broadcast %48 : vector<1x32xf32> to vector<16x32xf32>
    %55 = arith.addf %54, %53 : vector<16x32xf32>
    %56 = vector.extract_strided_slice %13 {offsets = [5, 0], sizes = [1, 32], strides = [1, 1]} : vector<32x32xf32> to vector<1x32xf32>
    %57 = vector.shape_cast %56 : vector<1x32xf32> to vector<32xf32>
    %58 = vector.shape_cast %57 : vector<32xf32> to vector<1x32xf32>
    %59 = vector.broadcast %58 : vector<1x32xf32> to vector<16x32xf32>
    %60 = arith.mulf %59, %6 : vector<16x32xf32>
    %61 = arith.addf %55, %60 : vector<16x32xf32>
    %62 = vector.extract_strided_slice %13 {offsets = [6, 0], sizes = [1, 32], strides = [1, 1]} : vector<32x32xf32> to vector<1x32xf32>
    %63 = vector.shape_cast %62 : vector<1x32xf32> to vector<32xf32>
    %64 = vector.shape_cast %63 : vector<32xf32> to vector<1x32xf32>
    %65 = vector.broadcast %64 : vector<1x32xf32> to vector<16x32xf32>
    %66 = arith.mulf %65, %9 : vector<16x32xf32>
    %67 = arith.addf %61, %66 : vector<16x32xf32>
    %68 = vector.extract_strided_slice %13 {offsets = [7, 0], sizes = [1, 32], strides = [1, 1]} : vector<32x32xf32> to vector<1x32xf32>
    %69 = vector.shape_cast %68 : vector<1x32xf32> to vector<32xf32>
    %70 = vector.shape_cast %69 : vector<32xf32> to vector<1x32xf32>
    %71 = vector.broadcast %70 : vector<1x32xf32> to vector<16x32xf32>
    %72 = arith.mulf %71, %12 : vector<16x32xf32>
    %73 = arith.addf %67, %72 : vector<16x32xf32>
    %c0_25 = arith.constant 0 : index
    %c0_26 = arith.constant 0 : index
    %c0_27 = arith.constant 0 : index
    %c32 = arith.constant 32 : index
    %74 = vector.load %arg6[%c0_25, %c0_26, %c0_27, %c32] : memref<1x4x16x64xf32, #tpu.memory_space<vmem>>, vector<1x1x16x32xf32>
    %75 = vector.shape_cast %74 : vector<1x1x16x32xf32> to vector<16x32xf32>
    %76 = vector.shape_cast %73 : vector<16x32xf32> to vector<1x1x16x32xf32>
    tpu.vector_store %arg6[%c0_25, %c0_26, %c0_27, %c32], %76 {strides = array<i32>} : memref<1x4x16x64xf32, #tpu.memory_space<vmem>>, vector<1x1x16x32xf32>,
    %77 = vector.extract_strided_slice %14 {offsets = [2, 0], sizes = [1, 32], strides = [1, 1]} : vector<8x32xf32> to vector<1x32xf32>
    %78 = vector.shape_cast %77 : vector<1x32xf32> to vector<32xf32>
    %79 = vector.shape_cast %78 : vector<32xf32> to vector<1x32xf32>
    %80 = vector.extract_strided_slice %13 {offsets = [8, 0], sizes = [1, 32], strides = [1, 1]} : vector<32x32xf32> to vector<1x32xf32>
    %81 = vector.shape_cast %80 : vector<1x32xf32> to vector<32xf32>
    %82 = vector.shape_cast %81 : vector<32xf32> to vector<1x32xf32>
    %83 = vector.broadcast %82 : vector<1x32xf32> to vector<16x32xf32>
    %84 = arith.mulf %83, %3 : vector<16x32xf32>
    %85 = vector.broadcast %79 : vector<1x32xf32> to vector<16x32xf32>
    %86 = arith.addf %85, %84 : vector<16x32xf32>
    %87 = vector.extract_strided_slice %13 {offsets = [9, 0], sizes = [1, 32], strides = [1, 1]} : vector<32x32xf32> to vector<1x32xf32>
    %88 = vector.shape_cast %87 : vector<1x32xf32> to vector<32xf32>
    %89 = vector.shape_cast %88 : vector<32xf32> to vector<1x32xf32>
    %90 = vector.broadcast %89 : vector<1x32xf32> to vector<16x32xf32>
    %91 = arith.mulf %90, %6 : vector<16x32xf32>
    %92 = arith.addf %86, %91 : vector<16x32xf32>
    %93 = vector.extract_strided_slice %13 {offsets = [10, 0], sizes = [1, 32], strides = [1, 1]} : vector<32x32xf32> to vector<1x32xf32>
    %94 = vector.shape_cast %93 : vector<1x32xf32> to vector<32xf32>
    %95 = vector.shape_cast %94 : vector<32xf32> to vector<1x32xf32>
    %96 = vector.broadcast %95 : vector<1x32xf32> to vector<16x32xf32>
    %97 = arith.mulf %96, %9 : vector<16x32xf32>
    %98 = arith.addf %92, %97 : vector<16x32xf32>
    %99 = vector.extract_strided_slice %13 {offsets = [11, 0], sizes = [1, 32], strides = [1, 1]} : vector<32x32xf32> to vector<1x32xf32>
    %100 = vector.shape_cast %99 : vector<1x32xf32> to vector<32xf32>
    %101 = vector.shape_cast %100 : vector<32xf32> to vector<1x32xf32>
    %102 = vector.broadcast %101 : vector<1x32xf32> to vector<16x32xf32>
    %103 = arith.mulf %102, %12 : vector<16x32xf32>
    %104 = arith.addf %98, %103 : vector<16x32xf32>
    %c0_28 = arith.constant 0 : index
    %c1_29 = arith.constant 1 : index
    %c0_30 = arith.constant 0 : index
    %c0_31 = arith.constant 0 : index
    %105 = vector.load %arg6[%c0_28, %c1_29, %c0_30, %c0_31] : memref<1x4x16x64xf32, #tpu.memory_space<vmem>>, vector<1x1x16x32xf32>
    %106 = vector.shape_cast %105 : vector<1x1x16x32xf32> to vector<16x32xf32>
    %107 = vector.shape_cast %104 : vector<16x32xf32> to vector<1x1x16x32xf32>
    tpu.vector_store %arg6[%c0_28, %c1_29, %c0_30, %c0_31], %107 {strides = array<i32>} : memref<1x4x16x64xf32, #tpu.memory_space<vmem>>, vector<1x1x16x32xf32>,
    %108 = vector.extract_strided_slice %14 {offsets = [3, 0], sizes = [1, 32], strides = [1, 1]} : vector<8x32xf32> to vector<1x32xf32>
    %109 = vector.shape_cast %108 : vector<1x32xf32> to vector<32xf32>
    %110 = vector.shape_cast %109 : vector<32xf32> to vector<1x32xf32>
    %111 = vector.extract_strided_slice %13 {offsets = [12, 0], sizes = [1, 32], strides = [1, 1]} : vector<32x32xf32> to vector<1x32xf32>
    %112 = vector.shape_cast %111 : vector<1x32xf32> to vector<32xf32>
    %113 = vector.shape_cast %112 : vector<32xf32> to vector<1x32xf32>
    %114 = vector.broadcast %113 : vector<1x32xf32> to vector<16x32xf32>
    %115 = arith.mulf %114, %3 : vector<16x32xf32>
    %116 = vector.broadcast %110 : vector<1x32xf32> to vector<16x32xf32>
    %117 = arith.addf %116, %115 : vector<16x32xf32>
    %118 = vector.extract_strided_slice %13 {offsets = [13, 0], sizes = [1, 32], strides = [1, 1]} : vector<32x32xf32> to vector<1x32xf32>
    %119 = vector.shape_cast %118 : vector<1x32xf32> to vector<32xf32>
    %120 = vector.shape_cast %119 : vector<32xf32> to vector<1x32xf32>
    %121 = vector.broadcast %120 : vector<1x32xf32> to vector<16x32xf32>
    %122 = arith.mulf %121, %6 : vector<16x32xf32>
    %123 = arith.addf %117, %122 : vector<16x32xf32>
    %124 = vector.extract_strided_slice %13 {offsets = [14, 0], sizes = [1, 32], strides = [1, 1]} : vector<32x32xf32> to vector<1x32xf32>
    %125 = vector.shape_cast %124 : vector<1x32xf32> to vector<32xf32>
    %126 = vector.shape_cast %125 : vector<32xf32> to vector<1x32xf32>
    %127 = vector.broadcast %126 : vector<1x32xf32> to vector<16x32xf32>
    %128 = arith.mulf %127, %9 : vector<16x32xf32>
    %129 = arith.addf %123, %128 : vector<16x32xf32>
    %130 = vector.extract_strided_slice %13 {offsets = [15, 0], sizes = [1, 32], strides = [1, 1]} : vector<32x32xf32> to vector<1x32xf32>
    %131 = vector.shape_cast %130 : vector<1x32xf32> to vector<32xf32>
    %132 = vector.shape_cast %131 : vector<32xf32> to vector<1x32xf32>
    %133 = vector.broadcast %132 : vector<1x32xf32> to vector<16x32xf32>
    %134 = arith.mulf %133, %12 : vector<16x32xf32>
    %135 = arith.addf %129, %134 : vector<16x32xf32>
    %c0_32 = arith.constant 0 : index
    %c1_33 = arith.constant 1 : index
    %c0_34 = arith.constant 0 : index
    %c32_35 = arith.constant 32 : index
    %136 = vector.load %arg6[%c0_32, %c1_33, %c0_34, %c32_35] : memref<1x4x16x64xf32, #tpu.memory_space<vmem>>, vector<1x1x16x32xf32>
    %137 = vector.shape_cast %136 : vector<1x1x16x32xf32> to vector<16x32xf32>
    %138 = vector.shape_cast %135 : vector<16x32xf32> to vector<1x1x16x32xf32>
    tpu.vector_store %arg6[%c0_32, %c1_33, %c0_34, %c32_35], %138 {strides = array<i32>} : memref<1x4x16x64xf32, #tpu.memory_space<vmem>>, vector<1x1x16x32xf32>,
    %139 = vector.extract_strided_slice %14 {offsets = [4, 0], sizes = [1, 32], strides = [1, 1]} : vector<8x32xf32> to vector<1x32xf32>
    %140 = vector.shape_cast %139 : vector<1x32xf32> to vector<32xf32>
    %141 = vector.shape_cast %140 : vector<32xf32> to vector<1x32xf32>
    %142 = vector.extract_strided_slice %13 {offsets = [16, 0], sizes = [1, 32], strides = [1, 1]} : vector<32x32xf32> to vector<1x32xf32>
    %143 = vector.shape_cast %142 : vector<1x32xf32> to vector<32xf32>
    %144 = vector.shape_cast %143 : vector<32xf32> to vector<1x32xf32>
    %145 = vector.broadcast %144 : vector<1x32xf32> to vector<16x32xf32>
    %146 = arith.mulf %145, %3 : vector<16x32xf32>
    %147 = vector.broadcast %141 : vector<1x32xf32> to vector<16x32xf32>
    %148 = arith.addf %147, %146 : vector<16x32xf32>
    %149 = vector.extract_strided_slice %13 {offsets = [17, 0], sizes = [1, 32], strides = [1, 1]} : vector<32x32xf32> to vector<1x32xf32>
    %150 = vector.shape_cast %149 : vector<1x32xf32> to vector<32xf32>
    %151 = vector.shape_cast %150 : vector<32xf32> to vector<1x32xf32>
    %152 = vector.broadcast %151 : vector<1x32xf32> to vector<16x32xf32>
    %153 = arith.mulf %152, %6 : vector<16x32xf32>
    %154 = arith.addf %148, %153 : vector<16x32xf32>
    %155 = vector.extract_strided_slice %13 {offsets = [18, 0], sizes = [1, 32], strides = [1, 1]} : vector<32x32xf32> to vector<1x32xf32>
    %156 = vector.shape_cast %155 : vector<1x32xf32> to vector<32xf32>
    %157 = vector.shape_cast %156 : vector<32xf32> to vector<1x32xf32>
    %158 = vector.broadcast %157 : vector<1x32xf32> to vector<16x32xf32>
    %159 = arith.mulf %158, %9 : vector<16x32xf32>
    %160 = arith.addf %154, %159 : vector<16x32xf32>
    %161 = vector.extract_strided_slice %13 {offsets = [19, 0], sizes = [1, 32], strides = [1, 1]} : vector<32x32xf32> to vector<1x32xf32>
    %162 = vector.shape_cast %161 : vector<1x32xf32> to vector<32xf32>
    %163 = vector.shape_cast %162 : vector<32xf32> to vector<1x32xf32>
    %164 = vector.broadcast %163 : vector<1x32xf32> to vector<16x32xf32>
    %165 = arith.mulf %164, %12 : vector<16x32xf32>
    %166 = arith.addf %160, %165 : vector<16x32xf32>
    %c0_36 = arith.constant 0 : index
    %c2_37 = arith.constant 2 : index
    %c0_38 = arith.constant 0 : index
    %c0_39 = arith.constant 0 : index
    %167 = vector.load %arg6[%c0_36, %c2_37, %c0_38, %c0_39] : memref<1x4x16x64xf32, #tpu.memory_space<vmem>>, vector<1x1x16x32xf32>
    %168 = vector.shape_cast %167 : vector<1x1x16x32xf32> to vector<16x32xf32>
    %169 = vector.shape_cast %166 : vector<16x32xf32> to vector<1x1x16x32xf32>
    tpu.vector_store %arg6[%c0_36, %c2_37, %c0_38, %c0_39], %169 {strides = array<i32>} : memref<1x4x16x64xf32, #tpu.memory_space<vmem>>, vector<1x1x16x32xf32>,
    %170 = vector.extract_strided_slice %14 {offsets = [5, 0], sizes = [1, 32], strides = [1, 1]} : vector<8x32xf32> to vector<1x32xf32>
    %171 = vector.shape_cast %170 : vector<1x32xf32> to vector<32xf32>
    %172 = vector.shape_cast %171 : vector<32xf32> to vector<1x32xf32>
    %173 = vector.extract_strided_slice %13 {offsets = [20, 0], sizes = [1, 32], strides = [1, 1]} : vector<32x32xf32> to vector<1x32xf32>
    %174 = vector.shape_cast %173 : vector<1x32xf32> to vector<32xf32>
    %175 = vector.shape_cast %174 : vector<32xf32> to vector<1x32xf32>
    %176 = vector.broadcast %175 : vector<1x32xf32> to vector<16x32xf32>
    %177 = arith.mulf %176, %3 : vector<16x32xf32>
    %178 = vector.broadcast %172 : vector<1x32xf32> to vector<16x32xf32>
    %179 = arith.addf %178, %177 : vector<16x32xf32>
    %180 = vector.extract_strided_slice %13 {offsets = [21, 0], sizes = [1, 32], strides = [1, 1]} : vector<32x32xf32> to vector<1x32xf32>
    %181 = vector.shape_cast %180 : vector<1x32xf32> to vector<32xf32>
    %182 = vector.shape_cast %181 : vector<32xf32> to vector<1x32xf32>
    %183 = vector.broadcast %182 : vector<1x32xf32> to vector<16x32xf32>
    %184 = arith.mulf %183, %6 : vector<16x32xf32>
    %185 = arith.addf %179, %184 : vector<16x32xf32>
    %186 = vector.extract_strided_slice %13 {offsets = [22, 0], sizes = [1, 32], strides = [1, 1]} : vector<32x32xf32> to vector<1x32xf32>
    %187 = vector.shape_cast %186 : vector<1x32xf32> to vector<32xf32>
    %188 = vector.shape_cast %187 : vector<32xf32> to vector<1x32xf32>
    %189 = vector.broadcast %188 : vector<1x32xf32> to vector<16x32xf32>
    %190 = arith.mulf %189, %9 : vector<16x32xf32>
    %191 = arith.addf %185, %190 : vector<16x32xf32>
    %192 = vector.extract_strided_slice %13 {offsets = [23, 0], sizes = [1, 32], strides = [1, 1]} : vector<32x32xf32> to vector<1x32xf32>
    %193 = vector.shape_cast %192 : vector<1x32xf32> to vector<32xf32>
    %194 = vector.shape_cast %193 : vector<32xf32> to vector<1x32xf32>
    %195 = vector.broadcast %194 : vector<1x32xf32> to vector<16x32xf32>
    %196 = arith.mulf %195, %12 : vector<16x32xf32>
    %197 = arith.addf %191, %196 : vector<16x32xf32>
    %c0_40 = arith.constant 0 : index
    %c2_41 = arith.constant 2 : index
    %c0_42 = arith.constant 0 : index
    %c32_43 = arith.constant 32 : index
    %198 = vector.load %arg6[%c0_40, %c2_41, %c0_42, %c32_43] : memref<1x4x16x64xf32, #tpu.memory_space<vmem>>, vector<1x1x16x32xf32>
    %199 = vector.shape_cast %198 : vector<1x1x16x32xf32> to vector<16x32xf32>
    %200 = vector.shape_cast %197 : vector<16x32xf32> to vector<1x1x16x32xf32>
    tpu.vector_store %arg6[%c0_40, %c2_41, %c0_42, %c32_43], %200 {strides = array<i32>} : memref<1x4x16x64xf32, #tpu.memory_space<vmem>>, vector<1x1x16x32xf32>,
    %201 = vector.extract_strided_slice %14 {offsets = [6, 0], sizes = [1, 32], strides = [1, 1]} : vector<8x32xf32> to vector<1x32xf32>
    %202 = vector.shape_cast %201 : vector<1x32xf32> to vector<32xf32>
    %203 = vector.shape_cast %202 : vector<32xf32> to vector<1x32xf32>
    %204 = vector.extract_strided_slice %13 {offsets = [24, 0], sizes = [1, 32], strides = [1, 1]} : vector<32x32xf32> to vector<1x32xf32>
    %205 = vector.shape_cast %204 : vector<1x32xf32> to vector<32xf32>
    %206 = vector.shape_cast %205 : vector<32xf32> to vector<1x32xf32>
    %207 = vector.broadcast %206 : vector<1x32xf32> to vector<16x32xf32>
    %208 = arith.mulf %207, %3 : vector<16x32xf32>
    %209 = vector.broadcast %203 : vector<1x32xf32> to vector<16x32xf32>
    %210 = arith.addf %209, %208 : vector<16x32xf32>
    %211 = vector.extract_strided_slice %13 {offsets = [25, 0], sizes = [1, 32], strides = [1, 1]} : vector<32x32xf32> to vector<1x32xf32>
    %212 = vector.shape_cast %211 : vector<1x32xf32> to vector<32xf32>
    %213 = vector.shape_cast %212 : vector<32xf32> to vector<1x32xf32>
    %214 = vector.broadcast %213 : vector<1x32xf32> to vector<16x32xf32>
    %215 = arith.mulf %214, %6 : vector<16x32xf32>
    %216 = arith.addf %210, %215 : vector<16x32xf32>
    %217 = vector.extract_strided_slice %13 {offsets = [26, 0], sizes = [1, 32], strides = [1, 1]} : vector<32x32xf32> to vector<1x32xf32>
    %218 = vector.shape_cast %217 : vector<1x32xf32> to vector<32xf32>
    %219 = vector.shape_cast %218 : vector<32xf32> to vector<1x32xf32>
    %220 = vector.broadcast %219 : vector<1x32xf32> to vector<16x32xf32>
    %221 = arith.mulf %220, %9 : vector<16x32xf32>
    %222 = arith.addf %216, %221 : vector<16x32xf32>
    %223 = vector.extract_strided_slice %13 {offsets = [27, 0], sizes = [1, 32], strides = [1, 1]} : vector<32x32xf32> to vector<1x32xf32>
    %224 = vector.shape_cast %223 : vector<1x32xf32> to vector<32xf32>
    %225 = vector.shape_cast %224 : vector<32xf32> to vector<1x32xf32>
    %226 = vector.broadcast %225 : vector<1x32xf32> to vector<16x32xf32>
    %227 = arith.mulf %226, %12 : vector<16x32xf32>
    %228 = arith.addf %222, %227 : vector<16x32xf32>
    %c0_44 = arith.constant 0 : index
    %c3_45 = arith.constant 3 : index
    %c0_46 = arith.constant 0 : index
    %c0_47 = arith.constant 0 : index
    %229 = vector.load %arg6[%c0_44, %c3_45, %c0_46, %c0_47] : memref<1x4x16x64xf32, #tpu.memory_space<vmem>>, vector<1x1x16x32xf32>
    %230 = vector.shape_cast %229 : vector<1x1x16x32xf32> to vector<16x32xf32>
    %231 = vector.shape_cast %228 : vector<16x32xf32> to vector<1x1x16x32xf32>
    tpu.vector_store %arg6[%c0_44, %c3_45, %c0_46, %c0_47], %231 {strides = array<i32>} : memref<1x4x16x64xf32, #tpu.memory_space<vmem>>, vector<1x1x16x32xf32>,
    %232 = vector.extract_strided_slice %14 {offsets = [7, 0], sizes = [1, 32], strides = [1, 1]} : vector<8x32xf32> to vector<1x32xf32>
    %233 = vector.shape_cast %232 : vector<1x32xf32> to vector<32xf32>
    %234 = vector.shape_cast %233 : vector<32xf32> to vector<1x32xf32>
    %235 = vector.extract_strided_slice %13 {offsets = [28, 0], sizes = [1, 32], strides = [1, 1]} : vector<32x32xf32> to vector<1x32xf32>
    %236 = vector.shape_cast %235 : vector<1x32xf32> to vector<32xf32>
    %237 = vector.shape_cast %236 : vector<32xf32> to vector<1x32xf32>
    %238 = vector.broadcast %237 : vector<1x32xf32> to vector<16x32xf32>
    %239 = arith.mulf %238, %3 : vector<16x32xf32>
    %240 = vector.broadcast %234 : vector<1x32xf32> to vector<16x32xf32>
    %241 = arith.addf %240, %239 : vector<16x32xf32>
    %242 = vector.extract_strided_slice %13 {offsets = [29, 0], sizes = [1, 32], strides = [1, 1]} : vector<32x32xf32> to vector<1x32xf32>
    %243 = vector.shape_cast %242 : vector<1x32xf32> to vector<32xf32>
    %244 = vector.shape_cast %243 : vector<32xf32> to vector<1x32xf32>
    %245 = vector.broadcast %244 : vector<1x32xf32> to vector<16x32xf32>
    %246 = arith.mulf %245, %6 : vector<16x32xf32>
    %247 = arith.addf %241, %246 : vector<16x32xf32>
    %248 = vector.extract_strided_slice %13 {offsets = [30, 0], sizes = [1, 32], strides = [1, 1]} : vector<32x32xf32> to vector<1x32xf32>
    %249 = vector.shape_cast %248 : vector<1x32xf32> to vector<32xf32>
    %250 = vector.shape_cast %249 : vector<32xf32> to vector<1x32xf32>
    %251 = vector.broadcast %250 : vector<1x32xf32> to vector<16x32xf32>
    %252 = arith.mulf %251, %9 : vector<16x32xf32>
    %253 = arith.addf %247, %252 : vector<16x32xf32>
    %254 = vector.extract_strided_slice %13 {offsets = [31, 0], sizes = [1, 32], strides = [1, 1]} : vector<32x32xf32> to vector<1x32xf32>
    %255 = vector.shape_cast %254 : vector<1x32xf32> to vector<32xf32>
    %256 = vector.shape_cast %255 : vector<32xf32> to vector<1x32xf32>
    %257 = vector.broadcast %256 : vector<1x32xf32> to vector<16x32xf32>
    %258 = arith.mulf %257, %12 : vector<16x32xf32>
    %259 = arith.addf %253, %258 : vector<16x32xf32>
    %c0_48 = arith.constant 0 : index
    %c3_49 = arith.constant 3 : index
    %c0_50 = arith.constant 0 : index
    %c32_51 = arith.constant 32 : index
    %260 = vector.load %arg6[%c0_48, %c3_49, %c0_50, %c32_51] : memref<1x4x16x64xf32, #tpu.memory_space<vmem>>, vector<1x1x16x32xf32>
    %261 = vector.shape_cast %260 : vector<1x1x16x32xf32> to vector<16x32xf32>
    %262 = vector.shape_cast %259 : vector<16x32xf32> to vector<1x1x16x32xf32>
    tpu.vector_store %arg6[%c0_48, %c3_49, %c0_50, %c32_51], %262 {strides = array<i32>} : memref<1x4x16x64xf32, #tpu.memory_space<vmem>>, vector<1x1x16x32xf32>,
    return
  }
  func.func @transform_0(%arg0: i32, %arg1: i32) -> (i32, i32, i32, i32) {
    %c0_i32 = arith.constant 0 : i32
    %c0_i32_0 = arith.constant 0 : i32
    %c0_i32_1 = arith.constant 0 : i32
    return %arg0, %c0_i32, %arg1, %c0_i32_0 : i32, i32, i32, i32
  }
  func.func @transform_1(%arg0: i32, %arg1: i32) -> (i32, i32) {
    %c0_i32 = arith.constant 0 : i32
    %c0_i32_0 = arith.constant 0 : i32
    %c0_i32_1 = arith.constant 0 : i32
    return %c0_i32, %c0_i32_0 : i32, i32
  }
  func.func @transform_2(%arg0: i32, %arg1: i32) -> (i32, i32) {
    %c0_i32 = arith.constant 0 : i32
    %c0_i32_0 = arith.constant 0 : i32
    %c0_i32_1 = arith.constant 0 : i32
    return %c0_i32, %c0_i32_0 : i32, i32
  }
  func.func @transform_3(%arg0: i32, %arg1: i32) -> (i32, i32) {
    %c0_i32 = arith.constant 0 : i32
    %c0_i32_0 = arith.constant 0 : i32
    %c0_i32_1 = arith.constant 0 : i32
    return %c0_i32, %c0_i32_0 : i32, i32
  }
  func.func @transform_4(%arg0: i32, %arg1: i32) -> (i32, i32, i32, i32) {
    %c0_i32 = arith.constant 0 : i32
    %c0_i32_0 = arith.constant 0 : i32
    %c0_i32_1 = arith.constant 0 : i32
    return %arg0, %c0_i32, %arg1, %c0_i32_0 : i32, i32, i32, i32
  }
}

</mosaic_0001>

<bundles_post_ra>
// kernel: tpu_custom_call.1
= control target key start
LH: loop header
LB: loop body
LE: loop exit
PB: predicated region body
PF: predicated region fallthrough
CT: control target
= control target key end

     0   :  { %9 = vsyncpa [#allocation3], 0  ;;  %s2028_s0 = inlined_call_operand.hbm [shape: f32[2,4,16,16], index: 0, kind: input, shape index: {}]   ;;  %s2029_s1 = inlined_call_operand.hbm [shape: f32[16,32], index: 1, kind: input, shape index: {}]   ;;  %s2030_s2 = inlined_call_operand.hbm [shape: f32[32,32], index: 2, kind: input, shape index: {}]   ;;  %s2031_s3 = inlined_call_operand.hbm [shape: f32[8,32], index: 3, kind: input, shape index: {}]   ;;  %s2032_s4 = inlined_call_operand.hbm [shape: f32[2,4,16,64], index: 4, kind: output, shape index: {}]  }
   0x1   :  { %11 = vsyncpa [#allocation3 + $0x1], 0 }
   0x2   :  { %12 = vsyncpa [#allocation6], 0 }
   0x3   :  { %13 = vsyncpa [#allocation9], 0 }
   0x4   :  { %14 = vsyncpa [#allocation4], 0 }
   0x5   :  { %16 = vsyncpa [#allocation4 + $0x1], 0  ;;  %s1516_s15 = smov 0   ;;  %s1518_s16 = smov 0  }
   0x6   :  { %s1520_s17 = smov 0   ;;  %s1522_s18 = smov 0  }
   0x7   :  { %s1524_s19 = smov 0   ;;  %s1526_s20 = smov 0  }
   0x8 LB: > { %s1094_s21 = sadd.s32 4294967295, %s1479_s20   ;;  %s1095_s22 = sadd.s32 4294967294, %s1479_s20   ;;  %s1479_s20 = sphi %s1526_s20, %s22_s20   ;;  %s1475_s19 = sphi %s1524_s19, %s2056_s19   ;;  %s1471_s18 = sphi %s1522_s18, %s2055_s18   ;;  %s1467_s17 = sphi %s1520_s17, %s2054_s17   ;;  %s1463_s16 = sphi %s1518_s16, %s2053_s16   ;;  %s1459_s15 = sphi %s1516_s15, %s2052_s15  }
   0x9   : > { %p56_p0 = scmp.ne.s32.totalorder %s1463_s16, %s1459_s15  ;;  %p1550_p1 = scmp.eq.s32.totalorder %s1094_s21, 0 }
   0xa   : > { %p1554_p2 = scmp.eq.s32.totalorder %s1094_s21, 1  ;;  %p151_p3 = scmp.eq.s32.totalorder %s1095_s22, 1 }
   0xb   : > { %p1560_p4 = por %p1550_p1, %p56_p0  ;;  %p1096_p5 = scmp.ge.s32.totalorder %s1479_s20, 1 }
   0xc   : > { %p1565_p6 = por %p151_p3, %p56_p0  ;;  %p158_p7 = scmp.lt.s32.totalorder %s1479_s20, 3 }
   0xd   : > { %s1481_s28 = smov [#allocation5]   ;;  %s1482_s5 = smov [#allocation7]  }
   0xe   : > { %s2040_s26 = scalar_select %p1565_p6, 1, 0 }
   0xf   : > { %p1570_p8 = pnand %p1096_p5, %p158_p7  ;;  %s170_s29 = sshll.u32 %s1481_s28, 4  ;;  %s171_s29 = int_to_ptr.vmem [resolvable:$true] %s170_s29 }
  0x10   : > { %s183_s6 = sshll.u32 %s1482_s5, 4  ;;  %s1483_s7 = smov [#allocation8]   ;;  %s184_s6 = int_to_ptr.vmem [resolvable:$true] %s183_s6 }
  0x11   : > { %p1203_p9 = pneg %p1570_p8  ;;  %s197_s8 = sshll.u32 %s1483_s7, 4  ;;  %s198_s8 = int_to_ptr.vmem [resolvable:$true] %s197_s8 }
  0x12   : > { %s1296_s9 = scalar_lea.vmem %s171_s29, 256  ;;  %p1304_p5 = scmp.lt.s32.totalorder %s171_s29, %s171_s29 }
  0x13   : > { %p1579_p11 = pnand %p1203_p9, %p1550_p1  ;;  %p1297_p13 = scmp.ne.s32.totalorder %s171_s29, %s1296_s9 }
  0x14   : > { %p1305_p7 = scmp.lt.s32.totalorder %s1296_s9, %s1296_s9 }
  0x15   : > { %p1287_p12 = pneg %p1579_p11 }
  0x16   : > { %p1306_p9 = por %p1305_p7, %p1304_p5 }
  0x17   : > { %p1299_p0 = pnand %p1297_p13, %p1287_p12 }
  0x19   : > { %p1300_p3 = pneg %p1299_p0 }
  0x1b   : > { %p1307_p10 = pnand %p1306_p9, %p1300_p3 }
  0x1d   : > { %1310 = shalt.err (!%p1307_p10)
}
  0x1e   : > { %s2033_s10 = smov 128   ;;  %s2034_s11 = smov 8  }
  0x1f   : > { %1206 = dma.hbm_to_vmem [thread:$0]  (!%p1579_p11), %s2029_s1, 256, %s171_s29, [#allocation6], %s2033_s10, %s2033_s10, %s2034_s11  }
  0x20   : > { %s1322_s14 = scalar_lea.vmem %s184_s6, 512  ;;  %p1330_p3 = scmp.lt.s32.totalorder %s184_s6, %s184_s6 }
  0x21   : > { %p1323_p13 = scmp.ne.s32.totalorder %s184_s6, %s1322_s14  ;;  %p1331_p10 = scmp.lt.s32.totalorder %s1322_s14, %s1322_s14 }
  0x23   : > { %p1325_p0 = pnand %p1323_p13, %p1287_p12  ;;  %p1332_p7 = por %p1331_p10, %p1330_p3 }
  0x25   : > { %p1326_p5 = pneg %p1325_p0 }
  0x27   : > { %p1333_p9 = pnand %p1332_p7, %p1326_p5 }
  0x29   : > { %1336 = shalt.err (!%p1333_p9)
}
  0x2a   : > { %1209 = dma.hbm_to_vmem [thread:$0]  (!%p1579_p11), %s2030_s2, 512, %s184_s6, [#allocation6], %s2033_s10, %s2033_s10, %s2034_s11  }
  0x2b   : > { %s1348_s28 = scalar_lea.vmem %s198_s8, 128  ;;  %p1356_p3 = scmp.lt.s32.totalorder %s198_s8, %s198_s8 }
  0x2c   : > { %p1349_p6 = scmp.ne.s32.totalorder %s198_s8, %s1348_s28  ;;  %p1357_p5 = scmp.lt.s32.totalorder %s1348_s28, %s1348_s28 }
  0x2e   : > { %p1351_p13 = pnand %p1349_p6, %p1287_p12  ;;  %p1358_p10 = por %p1357_p5, %p1356_p3 }
  0x30   : > { %p1352_p0 = pneg %p1351_p13 }
  0x32   : > { %p1359_p7 = pnand %p1358_p10, %p1352_p0 }
  0x34   : > { %1362 = shalt.err (!%p1359_p7)
}
  0x35   : > { %1212 = dma.hbm_to_vmem [thread:$0]  (!%p1579_p11), %s2031_s3, 128, %s198_s8, [#allocation9]  }
  0x36   : > { %s43_s6 = sadd.s32 1, %s1467_s17  ;;  %s34_s7 = sadd.s32 1, %s1475_s19 }
  0x37   : > { %p50_p6 = scmp.ne.s32.totalorder %s1467_s17, %s1463_s16  ;;  %p36_p12 = scmp.ge.s32.totalorder %s34_s7, 2 }
  0x38   : > { %p51_p9 = scmp.eq.s32.totalorder %s1479_s20, 0  ;;  %p1224_p0 = scmp.lt.s32.totalorder %s1479_s20, 2 }
  0x39   : > { %p1622_p13 = por %p1554_p2, %p50_p6  ;;  %s2058_s7 = smov (%p36_p12, %s34_s7), 0 }
  0x3a   : > { %p52_p3 = por %p51_p9, %p50_p6  ;;  %s208_s9 = sand.u32 1, %s1467_s17  }
  0x3b   : > { %s2043_s30 = scalar_select %p1622_p13, 1, 0 }
  0x3c   : > { %s38_s12 = ssub.s32 %s1475_s19, %s2058_s7  ;;  %s1101_s8 = sshll.u32 %s208_s9, 6 }
  0x3d   : > { %p41_p5 = scmp.eq.s32.totalorder %s38_s12, 0  ;;  %s1141_s13 = sshll.u32 %s1475_s19, 10 }
  0x3e   : > { %s220_s24 = scalar_lea.hbm %s2028_s0, %s1141_s13  ;;  %s212_s28 = scalar_lea.vmem [#allocation2], %s1101_s8 }
  0x3f   : > { %s1634_s14 = scalar_select %p41_p5, %s1467_s17, %s43_s6  }
  0x40   : > { %s221_s29 = sshll.u32 %s212_s28, 4  ;;  %p1641_p2 = pnand %p1224_p0, %p52_p3  ;;  %s222_s29 = int_to_ptr.vmem [resolvable:$true] %s221_s29 }
  0x41   : > { %s209_s10 = scalar_lea.sflag [#allocation3], %s208_s9  ;;  %s1376_s12 = scalar_lea.vmem %s222_s29, 1024 }
  0x42   : > { %p1365_p11 = pneg %p1641_p2  ;;  %p1377_p10 = scmp.ne.s32.totalorder %s222_s29, %s1376_s12 }
  0x43   : > { %s1486_s6 = smov [#allocation2]  }
  0x44   : > { %p1379_p7 = pnand %p1377_p10, %p1365_p11  ;;  %s1381_s11 = sshll.u32 %s1486_s6, 4  ;;  %s1382_s11 = int_to_ptr.vmem [resolvable:$false] %s1381_s11 }
  0x45   : > { %s1383_s13 = scalar_lea.vmem %s1382_s11, 2048  ;;  %p1384_p12 = scmp.lt.s32.totalorder %s222_s29, %s1382_s11 }
  0x46   : > { %p1380_p6 = pneg %p1379_p7  ;;  %p1385_p9 = scmp.lt.s32.totalorder %s1383_s13, %s1376_s12 }
  0x48   : > { %p1386_p5 = por %p1385_p9, %p1384_p12 }
  0x4a   : > { %p1387_p13 = pnand %p1386_p5, %p1380_p6 }
  0x4c   : > { %1390 = shalt.err (!%p1387_p13)
}
  0x4d   : > { %s2045_s8 = smov 8   ;;  %s2046_s21 = smov 128  }
  0x4e   : > { %1216 = dma.hbm_to_vmem [thread:$0]  (!%p1641_p2), %s220_s24, 1024, %s222_s29, %s209_s10, %s2046_s21, %s2046_s21, %s2045_s8  }
  0x4f   : > { %233 = sbr.rel (%p1570_p8) target bundleno = 456 (0x1c8), region = 36 }
  0x54   : > { %s1655_s9 = sand.u32 1, %s1463_s16  }
  0x55   : > { %s1105_s11 = sshll.u32 %s1655_s9, 6  ;;  %s236_s22 = scalar_lea.sflag [#allocation3], %s1655_s9 }
  0x56   : > { %s1661_s28 = scalar_lea.vmem [#allocation2], %s1105_s11 }
  0x57   : > { %1442 = dma.done.wait (%p1560_p4), %s236_s22, 1024  }
  0x58   : > { %1444 = vsyncadd (%p1560_p4), %s236_s22, 4294966272 }
  0x59   : > { %1446 = dma.done.wait (%p1550_p1), [#allocation6], 768  }
  0x5a   : > { %1448 = vsyncadd (%p1550_p1), [#allocation6], 4294966528 }
  0x5b   : > { %1450 = dma.done.wait (%p1550_p1), [#allocation9], 128  }
  0x5c   : > { %1452 = vsyncadd (%p1550_p1), [#allocation9], 4294967168  ;;  %v279_v0 = vld [vmem:[#allocation5 + $0x8] sm:$0xff]  ;;  %v278_v1 = vld [vmem:[#allocation5] sm:$0xff]  ;;  %vm282_vm0 = vcmask 130048   ;;  %v621_v10 = vlaneseq  ;;  %vm657_vm1 = vcmask 261120  }
  0x5d   : > { %v280_v2 = vld [vmem:[%s1661_s28] sm:$0xff]  ;;  %1159 = vmatprep.subr.mxu0 %v279_v0  ;;  %1166 = vmatprep.subr.mxu1 %v279_v0  ;;  %v281_v3 = vld [vmem:[%s1661_s28 + $0x8] sm:$0xff]  ;;  %v1112_v4 = vld [vmem:[%s1661_s28 + $0x10] sm:$0xff]  ;;  %s1861_s23 = scalar_lea.vmem [#allocation10], %s1105_s11  ;;  %s1487_s25 = smov 32   ;;  %vm704_vm2 = vcmask 523520  }
  0x5e   : > { %1160 = vmatpush3.msra.mxu0 %v279_v0  ;;  %1167 = vmatpush3.msra.mxu1 %v279_v0  ;;  %v1113_v5 = vld [vmem:[%s1661_s28 + $0x18] sm:$0xff]  ;;  %v1116_v6 = vld [vmem:[%s1661_s28 + $0x20] sm:$0xff]  ;;  %v1117_v7 = vld [vmem:[%s1661_s28 + $0x28] sm:$0xff]  ;;  %v622_v11 = vshrl.u32 %v621_v10, 7  ;;  %s1142_s27 = sshll.u32 %s1471_s18, 10  ;;  %s978_s10 = sshll.u32 %s1861_s23, 4  ;;  %s1976_s10 = int_to_ptr.vmem [resolvable:$true] %s978_s10 }
  0x5f   : > { %1161 = vmatprep.subr.mxu0 %v278_v1  ;;  %1163 = vmatprep.mubr.msk.f32.mxu0 %vm282_vm0, %v280_v2  ;;  %v1120_v8 = vld [vmem:[%s1661_s28 + $0x30] sm:$0xff]  ;;  %v1121_v9 = vld [vmem:[%s1661_s28 + $0x38] sm:$0xff]  ;;  %v618_v16 = vld [vmem:[#allocation7 + $0x10] sm:$0xff]  ;;  %s1974_s5 = scalar_lea.hbm %s2032_s4, %s1142_s27  ;;  %s963_s18 = scalar_lea.sflag [#allocation4], %s1655_s9 }
  0x60   : > { %1162 = vmatpush3.msra.mxu0 %v278_v1  ;;  %1168 = vmatprep.subr.mxu1 %v278_v1  ;;  %v623_v12 = vsub.s32 0, %v622_v11  ;;  %v616_v13 = vld [vmem:[#allocation7] sm:$0xff]  ;;  %v617_v15 = vld [vmem:[#allocation7 + $0x8] sm:$0xff]  ;;  %v643_v17 = vsub.s32 2, %v622_v11  ;;  %v635_v18 = vsub.s32 1, %v622_v11  ;;  %v619_v19 = vld [vmem:[#allocation7 + $0x18] sm:$0xff] }
  0x61   : > { %1164 = vmatmul.mubr.msk.f32.vlgmr.msra.gmra.mxu0 %vm282_vm0, %v281_v3  ;;  %1169 = vmatpush3.msra.mxu1 %v278_v1  ;;  %v620_v14 = vld [vmem:[#allocation8] sm:$0xff]  ;;  %v662_v20 = vsub.s32 4, %v622_v11  ;;  %v682_v23 = vsub.s32 6, %v622_v11  ;;  %v651_v27 = vsub.s32 3, %v622_v11  ;;  %v674_v31 = vsub.s32 5, %v622_v11  ;;  %s1391_s12 = scalar_lea.vmem %s1976_s10, 1024 }
  0x62   : > { %1170 = vmatprep.mubr.msk.f32.mxu1 %vm282_vm0, %v1112_v4  ;;  %1173 = vmatprep.subr.mxu0 %v279_v0  ;;  %v624_v21 = vrot.slane %v616_v13, %v623_v12  ;;  %v1691_v22 = vrot.slane %v620_v14, %v623_v12  ;;  %v710_v24 = vrot.slane %v617_v15, %v623_v12  ;;  %v690_v39 = vsub.s32 7, %v622_v11  ;;  %p1392_p1 = scmp.ne.s32.totalorder %s1976_s10, %s1391_s12  ;;  %p2049_p4 = scmp.ne.s32.totalorder %s2043_s30, 0 }
  0x63   : > { %1171 = vmatmul.mubr.msk.f32.vlgmr.msra.gmra.mxu1 %vm282_vm0, %v1113_v5  ;;  %1174 = vmatpush3.msra.mxu0 %v279_v0  ;;  %v795_v25 = vrot.slane %v618_v16, %v623_v12  ;;  %v1693_v26 = vrot.slane %v620_v14, %v662_v20  ;;  %v1695_v28 = vrot.slane %v620_v14, %v643_v17  ;;  %s1488_s6 = smov [#allocation10]  }
  0x64   : > { %1180 = vmatprep.subr.mxu1 %v279_v0  ;;  %1175 = vmatprep.subr.mxu0 %v278_v1  ;;  %v880_v29 = vrot.slane %v619_v19, %v623_v12  ;;  %v636_v30 = vrot.slane %v616_v13, %v635_v18  ;;  %v722_v32 = vrot.slane %v617_v15, %v635_v18  ;;  %p1393_p8 = pnand %p1392_p1, %p2049_p4  ;;  %s1395_s13 = sshll.u32 %s1488_s6, 4  ;;  %s1396_s13 = int_to_ptr.vmem [resolvable:$false] %s1395_s13 }
  0x65   : > { %1181 = vmatpush3.msra.mxu1 %v279_v0  ;;  %1176 = vmatpush3.msra.mxu0 %v278_v1  ;;  %v807_v33 = vrot.slane %v618_v16, %v635_v18  ;;  %v1697_v34 = vrot.slane %v619_v19, %v635_v18  ;;  %v1699_v35 = vrot.slane %v616_v13, %v643_v17  ;;  %s1397_s8 = scalar_lea.vmem %s1396_s13, 2048  ;;  %p1398_p0 = scmp.lt.s32.totalorder %s1976_s10, %s1396_s13 }
  0x66   : > { %1177 = vmatprep.mubr.msk.f32.mxu0 %vm282_vm0, %v1116_v6  ;;  %1182 = vmatprep.subr.mxu1 %v278_v1  ;;  %v1701_v36 = vrot.slane %v617_v15, %v643_v17  ;;  %v1703_v37 = vrot.slane %v618_v16, %v643_v17  ;;  %v1705_v38 = vrot.slane %v620_v14, %v682_v23  ;;  %p1394_p13 = pneg %p1393_p8  ;;  %p1399_p3 = scmp.lt.s32.totalorder %s1397_s8, %s1391_s12 }
  0x67   : > { %1178 = vmatmul.mubr.msk.f32.vlgmr.msra.gmra.mxu0 %vm282_vm0, %v1117_v7  ;;  %1183 = vmatpush3.msra.mxu1 %v278_v1  ;;  %v1707_v40 = vrot.slane %v619_v19, %v643_v17  ;;  %v1709_v41 = vrot.slane %v616_v13, %v651_v27  ;;  %v1711_v42 = vrot.slane %v617_v15, %v662_v20 }
  0x68   : > { %1184 = vmatprep.mubr.msk.f32.mxu1 %vm282_vm0, %v1120_v8  ;;  %v1713_v43 = vrot.slane %v620_v14, %v651_v27  ;;  %v1715_v44 = vrot.slane %v617_v15, %v651_v27  ;;  %v1717_v45 = vrot.slane %v618_v16, %v651_v27  ;;  %v1719_v46 = vrot.slane %v619_v19, %v651_v27  ;;  %p1400_p2 = por %p1399_p3, %p1398_p0 }
  0x69   : > { %1185 = vmatmul.mubr.msk.f32.vlgmr.msra.gmra.mxu1 %vm282_vm0, %v1121_v9  ;;  %v1721_v47 = vrot.slane %v617_v15, %v674_v31  ;;  %v1723_v48 = vrot.slane %v616_v13, %v662_v20  ;;  %v1725_v49 = vrot.slane %v620_v14, %v635_v18  ;;  %v1727_v50 = vrot.slane %v616_v13, %v674_v31 }
  0x6a   : > { %v1729_v51 = vrot.slane %v618_v16, %v662_v20  ;;  %v1731_v52 = vrot.slane %v617_v15, %v682_v23  ;;  %v1733_v53 = vrot.slane %v616_v13, %v682_v23  ;;  %v1735_v54 = vrot.slane %v620_v14, %v674_v31  ;;  %p1401_p11 = pnand %p1400_p2, %p1394_p13 }
  0x6b   : > { %v1737_v55 = vrot.slane %v618_v16, %v674_v31  ;;  %v1739_v56 = vrot.slane %v617_v15, %v690_v39  ;;  %v1741_v57 = vrot.slane %v616_v13, %v690_v39  ;;  %v1743_v58 = vrot.slane %v618_v16, %v682_v23 }
  0x6c   : > { %v1745_v59 = vrot.slane %v618_v16, %v690_v39  ;;  %v1747_v61 = vrot.slane %v619_v19, %v662_v20  ;;  %v1749_v62 = vrot.slane %v620_v14, %v690_v39  ;;  %v1751_v63 = vrot.slane %v619_v19, %v674_v31 }
  0x6d   : > { %v1753_v0 = vrot.slane %v619_v19, %v682_v23  ;;  %v1755_v4 = vrot.slane %v619_v19, %v690_v39 }
  0x6f   : > { %2047 = vst [vmem:[#allocation15_spill] sm:$0xff] %v1755_v4 }
 0x121   : > { %v1165_v60 = vpop.f32.mrf.mxu0 }
 0x122   : > { %v626_v1 = vmul.f32 %v1165_v60, %v624_v21  ;;  %v712_v2 = vmul.f32 %v1165_v60, %v710_v24  ;;  %v797_v3 = vmul.f32 %v1165_v60, %v795_v25  ;;  %v882_v5 = vmul.f32 %v1165_v60, %v880_v29 }
 0x123   : > { %v1757_v6 = vpop.f32.mrf.mxu1  ;;  %v1759_v7 = vpop.f32.mrf.mxu0  ;;  %v1762_v8 = vmul.f32 %v1165_v60, %v1711_v42  ;;  %v1765_v9 = vmul.f32 %v1165_v60, %v1723_v48  ;;  %v1768_v10 = vmul.f32 %v1165_v60, %v1729_v51  ;;  %v1780_v19 = vmul.f32 %v1165_v60, %v1747_v61 }
 0x124   : > { %v632_v11 = vadd.f32 %v1691_v22, %v626_v1  ;;  %v718_v12 = vadd.f32 %v1695_v28, %v712_v2  ;;  %v803_v13 = vadd.f32 %v1693_v26, %v797_v3  ;;  %v638_v14 = vmul.f32 %v1757_v6, %v636_v30 }
 0x125   : > { %v724_v15 = vmul.f32 %v1757_v6, %v722_v32  ;;  %v809_v16 = vmul.f32 %v1757_v6, %v807_v33  ;;  %v625_v17 = vmul.f32 %v624_v21, %v1759_v7  ;;  %v1777_v18 = vpop.f32.mrf.mxu1  ;;  %v894_v23 = vmul.f32 %v1757_v6, %v1697_v34 }
 0x126   : > { %v640_v20 = vadd.f32 %v638_v14, %v632_v11  ;;  %v711_v27 = vmul.f32 %v710_v24, %v1759_v7  ;;  %v796_v31 = vmul.f32 %v795_v25, %v1759_v7  ;;  %v881_v2 = vmul.f32 %v880_v29, %v1759_v7 }
 0x127   : > { %v726_v39 = vadd.f32 %v724_v15, %v718_v12  ;;  %v811_v1 = vadd.f32 %v809_v16, %v803_v13  ;;  %v637_v3 = vmul.f32 %v636_v30, %v1777_v18  ;;  %v1788_v21 = vpop.f32.mrf.mxu0  ;;  %v723_v4 = vmul.f32 %v722_v32, %v1777_v18 }
 0x128   : > { %v808_v60 = vmul.f32 %v807_v33, %v1777_v18  ;;  %v631_v11 = vadd.f32 %v1691_v22, %v625_v17  ;;  %v646_v14 = vmul.f32 %v1788_v21, %v1699_v35  ;;  %v893_v24 = vmul.f32 %v1697_v34, %v1777_v18 }
 0x129   : > { %v1797_v25 = vpop.f32.mrf.mxu1  ;;  %v1799_v12 = vpop.f32.mrf.mxu0  ;;  %v717_v29 = vadd.f32 %v1695_v28, %v711_v27  ;;  %v732_v30 = vmul.f32 %v1788_v21, %v1701_v36  ;;  %v802_v32 = vadd.f32 %v1693_v26, %v796_v31  ;;  %v817_v34 = vmul.f32 %v1788_v21, %v1703_v37 }
 0x12a   : > { %v639_v33 = vadd.f32 %v637_v3, %v631_v11  ;;  %v645_v22 = vmul.f32 %v1699_v35, %v1799_v12  ;;  %v731_v13 = vmul.f32 %v1701_v36, %v1799_v12  ;;  %v1811_v15 = vadd.f32 %v646_v14, %v640_v20 }
 0x12b   : > { %v725_v16 = vadd.f32 %v723_v4, %v717_v29  ;;  %v810_v28 = vadd.f32 %v808_v60, %v802_v32  ;;  %v816_v17 = vmul.f32 %v1703_v37, %v1799_v12  ;;  %v1815_v27 = vpop.f32.mrf.mxu1  ;;  %v1817_v31 = vadd.f32 %v732_v30, %v726_v39 }
 0x12c   : > { %v647_v26 = vadd.f32 %v645_v22, %v639_v33  ;;  %v887_v35 = vadd.f32 %v1705_v38, %v881_v2  ;;  %v888_v3 = vadd.f32 %v1705_v38, %v882_v5  ;;  %v901_v20 = vmul.f32 %v1707_v40, %v1799_v12 }
 0x12d   : > { %v733_v36 = vadd.f32 %v731_v13, %v725_v16  ;;  %v818_v11 = vadd.f32 %v816_v17, %v810_v28  ;;  %v902_v4 = vmul.f32 %v1788_v21, %v1707_v40  ;;  %v1825_v60 = vadd.f32 %v817_v34, %v811_v1 }
 0x12e   : > { %v895_v37 = vadd.f32 %v893_v24, %v887_v35  ;;  %v896_v14 = vadd.f32 %v894_v23, %v888_v3  ;;  %v653_v39 = vmul.f32 %v1709_v41, %v1815_v27  ;;  %v1831_v2 = vmul.f32 %v1797_v25, %v1709_v41 }
 0x12f   : > { %v739_v38 = vmul.f32 %v1715_v44, %v1815_v27  ;;  %v1837_v5 = vmul.f32 %v1797_v25, %v1715_v44  ;;  %v824_v40 = vmul.f32 %v1717_v45, %v1815_v27  ;;  %v1843_v24 = vmul.f32 %v1797_v25, %v1717_v45 }
 0x130   : > { %v903_v1 = vadd.f32 %v901_v20, %v895_v37  ;;  %v655_v23 = vadd.f32 %v653_v39, %v647_v26  ;;  %v909_v41 = vmul.f32 %v1719_v46, %v1815_v27  ;;  %v1847_v29 = vadd.f32 %v902_v4, %v896_v14 }
 0x131   : > { %v741_v30 = vadd.f32 %v739_v38, %v733_v36  ;;  %v826_v32 = vadd.f32 %v824_v40, %v818_v11  ;;  %v757_v44 = vadd.f32 %v1713_v43, %v1762_v8  ;;  %v1853_v33 = vmul.f32 %v1797_v25, %v1719_v46 }
 0x132   : > { %v911_v22 = vadd.f32 %v909_v41, %v903_v1  ;;  %v763_v13 = vmul.f32 %v1757_v6, %v1721_v47  ;;  %v771_v45 = vmul.f32 %v1788_v21, %v1731_v52  ;;  %658 = vst.msk [vmem:[%s1861_s23] sm:$0xff] %vm657_vm1, %v655_v23  ;;  %v779_v46 = vmul.f32 %v1797_v25, %v1739_v56 }
 0x133   : > { %v671_v8 = vadd.f32 %v1725_v49, %v1765_v9  ;;  %v677_v34 = vmul.f32 %v1757_v6, %v1727_v50  ;;  %v685_v16 = vmul.f32 %v1788_v21, %v1733_v53  ;;  %1124 = vst.msk [vmem:[%s1861_s23 + $0x10] sm:$0xff] %vm657_vm1, %v741_v30  ;;  %1128 = vst.msk [vmem:[%s1861_s23 + $0x20] sm:$0xff] %vm657_vm1, %v826_v32 }
 0x134   : > { %v765_v28 = vadd.f32 %v763_v13, %v757_v44  ;;  %v842_v17 = vadd.f32 %v1735_v54, %v1768_v10  ;;  %v848_v26 = vmul.f32 %v1757_v6, %v1737_v55  ;;  %v856_v9 = vmul.f32 %v1788_v21, %v1743_v58  ;;  %1132 = vst.msk [vmem:[%s1861_s23 + $0x30] sm:$0xff] %vm657_vm1, %v911_v22 }
 0x135   : > { %v679_v35 = vadd.f32 %v677_v34, %v671_v8  ;;  %v693_v3 = vmul.f32 %v1797_v25, %v1741_v57  ;;  %v864_v36 = vmul.f32 %v1797_v25, %v1745_v59  ;;  %v664_v11 = vmul.f32 %v1723_v48, %v1759_v7  ;;  %v2048_v8 = vld [vmem:[#allocation15_spill] sm:$0xff] }
 0x136   : > { %v773_v20 = vadd.f32 %v771_v45, %v765_v28  ;;  %v850_v10 = vadd.f32 %v848_v26, %v842_v17  ;;  %v676_v4 = vmul.f32 %v1727_v50, %v1777_v18  ;;  %v684_v37 = vmul.f32 %v1733_v53, %v1799_v12 }
 0x137   : > { %v687_v14 = vadd.f32 %v685_v16, %v679_v35  ;;  %v670_v39 = vadd.f32 %v1725_v49, %v664_v11  ;;  %v692_v38 = vmul.f32 %v1741_v57, %v1815_v27  ;;  %v750_v40 = vmul.f32 %v1711_v42, %v1759_v7 }
 0x138   : > { %v781_v1 = vadd.f32 %v779_v46, %v773_v20  ;;  %v858_v23 = vadd.f32 %v856_v9, %v850_v10  ;;  %v762_v48 = vmul.f32 %v1721_v47, %v1777_v18  ;;  %v770_v50 = vmul.f32 %v1731_v52, %v1799_v12 }
 0x139   : > { %v695_v41 = vadd.f32 %v693_v3, %v687_v14  ;;  %v678_v30 = vadd.f32 %v676_v4, %v670_v39  ;;  %v756_v53 = vadd.f32 %v1713_v43, %v750_v40  ;;  %v835_v49 = vmul.f32 %v1729_v51, %v1759_v7 }
 0x13a   : > { %786 = vrot.lane.b32.xlu1 %v781_v1, %s1487_s25  ;;  %v866_v57 = vadd.f32 %v864_v36, %v858_v23  ;;  %v778_v42 = vmul.f32 %v1739_v56, %v1815_v27  ;;  %v847_v47 = vmul.f32 %v1737_v55, %v1777_v18  ;;  %v855_v52 = vmul.f32 %v1743_v58, %v1799_v12 }
 0x13b   : > { %700 = vrot.lane.b32.xlu0 %v695_v41, %s1487_s25  ;;  %v686_v32 = vadd.f32 %v684_v37, %v678_v30  ;;  %v764_v43 = vadd.f32 %v762_v48, %v756_v53  ;;  %v841_v44 = vadd.f32 %v1735_v54, %v835_v49  ;;  %v927_v51 = vadd.f32 %v1749_v62, %v1780_v19 }
 0x13c   : > { %v863_v22 = vmul.f32 %v1745_v59, %v1815_v27  ;;  %v933_v56 = vmul.f32 %v1757_v6, %v1751_v63  ;;  %v941_v55 = vmul.f32 %v1788_v21, %v1753_v0  ;;  %v920_v58 = vmul.f32 %v1747_v61, %v1759_v7 }
 0x13d   : > { %v694_v13 = vadd.f32 %v692_v38, %v686_v32  ;;  %v772_v45 = vadd.f32 %v770_v50, %v764_v43  ;;  %v849_v46 = vadd.f32 %v847_v47, %v841_v44  ;;  %v949_v54 = vmul.f32 %v1797_v25, %v2048_v8 }
 0x13e   : > { %871 = vrot.lane.b32.xlu1 %v866_v57, %s1487_s25  ;;  %v935_v59 = vadd.f32 %v933_v56, %v927_v51  ;;  %v926_v19 = vadd.f32 %v1749_v62, %v920_v58  ;;  %v932_v6 = vmul.f32 %v1751_v63, %v1777_v18  ;;  %v940_v61 = vmul.f32 %v1753_v0, %v1799_v12 }
 0x13f   : > { %698 = vrot.lane.b32.xlu0 %v694_v13, %s1487_s25  ;;  %v780_v7 = vadd.f32 %v778_v42, %v772_v45  ;;  %v857_v21 = vadd.f32 %v855_v52, %v849_v46  ;;  %v742_v25 = vadd.f32 %v1837_v5, %v1817_v31  ;;  %v656_v34 = vadd.f32 %v1831_v2, %v1811_v15 }
 0x140   : > { %v943_v16 = vadd.f32 %v941_v55, %v935_v59  ;;  %v934_v62 = vadd.f32 %v932_v6, %v926_v19  ;;  %v827_v63 = vadd.f32 %v1843_v24, %v1825_v60  ;;  %v912_v18 = vadd.f32 %v1853_v33, %v1847_v29 }
 0x141   : > { %v865_v0 = vadd.f32 %v863_v22, %v857_v21  ;;  %1125 = vst.msk [vmem:[%s1861_s23 + $0x18] sm:$0xff] %vm657_vm1, %v742_v25  ;;  %659 = vst.msk [vmem:[%s1861_s23 + $0x8] sm:$0xff] %vm657_vm1, %v656_v34  ;;  %v948_v15 = vmul.f32 %v2048_v8, %v1815_v27 }
 0x142   : > { %784 = vrot.lane.b32.xlu1 %v780_v7, %s1487_s25  ;;  %v942_v12 = vadd.f32 %v940_v61, %v934_v62  ;;  %1129 = vst.msk [vmem:[%s1861_s23 + $0x28] sm:$0xff] %vm657_vm1, %v827_v63  ;;  %1133 = vst.msk [vmem:[%s1861_s23 + $0x38] sm:$0xff] %vm657_vm1, %v912_v18  ;;  %v951_v31 = vadd.f32 %v949_v54, %v943_v16 }
 0x143   : > { %869 = vrot.lane.b32.xlu0 %v865_v0, %s1487_s25 }
 0x144   : > { %v950_v60 = vadd.f32 %v948_v15, %v942_v12 }
 0x146   : > { %956 = vrot.lane.b32.xlu1 %v951_v31, %s1487_s25 }
 0x147   : > { %954 = vrot.lane.b32.xlu0 %v950_v60, %s1487_s25 }
 0x1ac   : > { %v787_v2 = vpop.permute.xlu1 %786 }
 0x1ad   : > { %1127 = vst.msk [vmem:[%s1861_s23 + $0x18] sm:$0xff] %vm704_vm2, %v787_v2  ;;  %v701_v5 = vpop.permute.xlu0 %700 }
 0x1ae   : > { %706 = vst.msk [vmem:[%s1861_s23 + $0x8] sm:$0xff] %vm704_vm2, %v701_v5 }
 0x1b0   : > { %v872_v24 = vpop.permute.xlu1 %871 }
 0x1b1   : > { %1131 = vst.msk [vmem:[%s1861_s23 + $0x28] sm:$0xff] %vm704_vm2, %v872_v24  ;;  %v699_v27 = vpop.permute.xlu0 %698 }
 0x1b2   : > { %705 = vst.msk [vmem:[%s1861_s23] sm:$0xff] %vm704_vm2, %v699_v27 }
 0x1b4   : > { %v785_v29 = vpop.permute.xlu1 %784 }
 0x1b5   : > { %1126 = vst.msk [vmem:[%s1861_s23 + $0x10] sm:$0xff] %vm704_vm2, %v785_v29  ;;  %v870_v33 = vpop.permute.xlu0 %869 }
 0x1b6   : > { %1130 = vst.msk [vmem:[%s1861_s23 + $0x20] sm:$0xff] %vm704_vm2, %v870_v33 }
 0x1b8   : > { %v957_v28 = vpop.permute.xlu1 %956 }
 0x1b9   : > { %1135 = vst.msk [vmem:[%s1861_s23 + $0x38] sm:$0xff] %vm704_vm2, %v957_v28  ;;  %v955_v17 = vpop.permute.xlu0 %954 }
 0x1ba   : > { %1134 = vst.msk [vmem:[%s1861_s23 + $0x30] sm:$0xff] %vm704_vm2, %v955_v17 }
 0x1bb   : > { %1404 = shalt.err (!%p1401_p11)
}
 0x1bc   : > { %s1405_s21 = scalar_lea.hbm %s1974_s5, 1024  ;;  %s1409_s28 = scalar_lea.hbm %s2032_s4, 2048 }
 0x1bd   : > { %p1406_p10 = scmp.ne.s32.totalorder %s1974_s5, %s1405_s21  ;;  %p1410_p12 = scmp.lt.s32.totalorder %s1974_s5, %s2032_s4 }
 0x1be   : > { %p1411_p9 = scmp.lt.s32.totalorder %s1409_s28, %s1405_s21 }
 0x1bf   : > { %p1407_p7 = pnand %p1406_p10, %p2049_p4 }
 0x1c0   : > { %p1412_p5 = por %p1411_p9, %p1410_p12 }
 0x1c1   : > { %p1408_p6 = pneg %p1407_p7 }
 0x1c3   : > { %p1413_p1 = pnand %p1412_p5, %p1408_p6 }
 0x1c5   : > { %1416 = shalt.err (!%p1413_p1)
}
 0x1c6   : > { %s1489_s27 = smov 128   ;;  %s1490_s24 = smov 8  }
 0x1c7   : > { %1201 = dma.vmem_to_hbm [thread:$0]  (%p2049_p4), %s1976_s10, 1024, %s1974_s5, %s963_s18, %s1489_s27, %s1489_s27, %s1490_s24  }
 0x1c8 PF: > { %s993_s29 = sand.u32 1, %s1459_s15   ;;  %p2050_p8 = scmp.ne.s32.totalorder %s2040_s26, 0 }
 0x1c9   : > { %p2051_p13 = scmp.ge.s32.totalorder %s1479_s20, 2  ;;  %s994_s12 = scalar_lea.sflag [#allocation4], %s993_s29 }
 0x1cb   : > { %p1218_p0 = pnand %p2051_p13, %p2050_p8 }
 0x1cd   : > { %p1219_p3 = pneg %p1218_p0 }
 0x1cf   : > { %1454 = dma.done.wait (%p1219_p3), %s994_s12, 1024  }
 0x1d0   : > { %1456 = vsyncadd (%p1219_p3), %s994_s12, 4294966272  ;;  %s22_s20 = sadd.s32 1, %s1479_s20   ;;  %s2052_s15 = smov %s1463_s16 }
 0x1d1   : > { %p19_p2 = scmp.ge.s32.totalorder %s22_s20, 4   ;;  %s2053_s16 = smov %s1467_s17 }
 0x1d2   : > { %s2054_s17 = smov %s1634_s14  ;;  %s2055_s18 = smov %s1475_s19 }
 0x1d3   : > { %s2056_s19 = smov %s2058_s7  ;;  %21 = sbr.rel (!%p19_p2) target bundleno = 8 (0x8), region = 99 }
 0x1d8   :  { %999 = vsyncpa [#allocation3], 1 }
 0x1d9   :  { %1001 = vsyncpa [#allocation3 + $0x1], 1 }
 0x1da   :  { %1002 = vsyncpa [#allocation6], 1 }
 0x1db   :  { %1003 = vsyncpa [#allocation9], 1 }
 0x1dc   :  { %1004 = vsyncpa [#allocation4], 1 }
 0x1dd   :  { %1006 = vsyncpa [#allocation4 + $0x1], 1 }

</bundles_post_ra>
